<compile_context>
chip_gen: v5e
topology: v5e:2x2
jax: 0.10.0
libtpu: 0.0.40
codegen_flags: <defaults>
</compile_context>

<pallas_src>
import jax
import jax.numpy as jnp
from jax.experimental import pallas as pl
from jax.experimental.pallas import tpu as pltpu

_LANE = 128
_TARGET_LANE_TILE = 1024               # max lanes per tile (multiple of 128)
_TILE_BYTE_BUDGET = 4 * 1024 * 1024    # per-buffer tile budget (bytes)
_SMALL_BYTES = 128 * 1024              # below this, plain XLA slice wins


def _copy_kernel(x_ref, o_ref):
    # Straight block copy; the chomp lives entirely in the grid extent /
    # output shape, so interior tiles are unmasked full-lane loads & stores.
    o_ref[...] = x_ref[...]


def _pick_lane_tile(l_out: int) -> int:
    """128-multiple lane tile minimizing read traffic (incl. the padded tail
    tile), tie-broken toward fewer tiles (larger tl)."""
    max_tl = min(_TARGET_LANE_TILE, (l_out // _LANE) * _LANE)
    best_tl, best_key = _LANE, None
    for tl in range(max_tl, 0, -_LANE):
        n_l = -(-l_out // tl)
        key = (n_l * tl, n_l)
        if best_key is None or key < best_key:
            best_key, best_tl = key, tl
    return best_tl


def chomp1d(x: jax.Array, chomp_size: int) -> jax.Array:
    """Equivalent of PyTorch Chomp1d.forward on an NCL tensor."""
    if chomp_size <= 0:
        return x

    B, C, L = x.shape
    L_out = L - chomp_size
    if L_out <= 0:
        raise ValueError("chomp_size must be smaller than the sequence length")

    itemsize = jnp.dtype(x.dtype).itemsize
    rows = B * C

    # Small / short-sequence early-out: fixed pallas_call overhead (and
    # sub-128-lane masked stores) dominate; XLA's own slice copy is already at
    # roofline for tiny arrays.
    if L_out < _LANE or rows * L_out * itemsize < _SMALL_BYTES:
        return x[:, :, :L_out]

    # Collapse (B, C) into one sublane axis — free reshape for row-major NCL.
    x2 = x.reshape(rows, L)

    # ---- lane (last-axis) tiling -------------------------------------------
    tl = _pick_lane_tile(L_out)
    n_l = pl.cdiv(L_out, tl)

    # ---- row (sublane-axis) tiling -----------------------------------------
    granule = max(8, 32 // itemsize)            # 8 f32 / 16 bf16 / 32 int8
    budget_rows = max(granule, _TILE_BYTE_BUDGET // (tl * itemsize))
    if rows <= budget_rows:
        tr = rows                               # full dim: always layout-legal
    else:
        tr = max(granule, (min(budget_rows, rows) // granule) * granule)
    # Ensure the leading parallel axis has >= 2 tiles so both v7x TensorCores
    # get work (harmless on single-TC v5e/v6e).
    if tr == rows and rows >= 2 * granule:
        half = (rows + 1) // 2
        tr = ((half + granule - 1) // granule) * granule
    n_r = pl.cdiv(rows, tr)

    grid = (n_r, n_l)
    index_map = lambda r, l: (r, l)             # chomp lives in the grid extent
    block = (tr, tl)

    tile_bytes = tr * tl * itemsize             # one buffer's tile
    # Double-buffered in + out tiles, plus headroom for internal scratch;
    # never request more than the 32 MiB scoped default (v7x has 64 MiB total).
    vmem_limit = int(min(32 * 1024 * 1024,
                         max(8 * 1024 * 1024,
                             4 * tile_bytes + 2 * 1024 * 1024)))

    cost = pl.CostEstimate(
        flops=0,
        transcendentals=0,
        bytes_accessed=2 * rows * L_out * itemsize,   # pure bandwidth op
    )

    y2 = pl.pallas_call(
        _copy_kernel,
        out_shape=jax.ShapeDtypeStruct((rows, L_out), x.dtype),
        grid_spec=pltpu.PrefetchScalarGridSpec(
            num_scalar_prefetch=0,
            grid=grid,
            in_specs=[pl.BlockSpec(block, index_map)],
            out_specs=pl.BlockSpec(block, index_map),
        ),
        compiler_params=pltpu.CompilerParams(
            dimension_semantics=("parallel", "parallel"),
            vmem_limit_bytes=vmem_limit,
        ),
        cost_estimate=cost,
    )(x2)

    return y2.reshape(B, C, L_out)


if __name__ == "__main__":
    key = jax.random.PRNGKey(0)

    # Case 1: module-scale small shape -> plain-slice early-out path.
    B, C, L, chomp = 2, 4, 16, 3
    x = jax.random.normal(key, (B, C, L), dtype=jnp.float32)
    y = jax.block_until_ready(chomp1d(x, chomp))
    assert y.shape == (B, C, L - chomp)
    assert jnp.array_equal(y, x[:, :, :-chomp]), "early-out path mismatch"

    # Case 2: Pallas path, lane-aligned L_out (f32). rows=96, L_out=512.
    k2 = jax.random.fold_in(key, 1)
    B2, C2, L2, chomp2 = 2, 48, 640, 128
    x2 = jax.random.normal(k2, (B2, C2, L2), dtype=jnp.float32)
    y2 = jax.block_until_ready(chomp1d(x2, chomp2))
    assert jnp.array_equal(y2, x2[:, :, :-chomp2]), "aligned Pallas path mismatch"

    # Case 3: Pallas path, unaligned L_out + partial row/lane tiles (bf16).
    # rows=200, L_out=623.
    k3 = jax.random.fold_in(key, 2)
    B3, C3, L3, chomp3 = 2, 100, 700, 77
    x3 = jax.random.normal(k3, (B3, C3, L3), dtype=jnp.bfloat16)
    y3 = jax.block_until_ready(chomp1d(x3, chomp3))
    assert jnp.array_equal(y3, x3[:, :, :-chomp3]), "unaligned Pallas path mismatch"

    # chomp_size == 0 follows the module's guard: return x unchanged.
    assert chomp1d(x, 0) is x

    print("KERNEL_OK")
</pallas_src>

<mosaic_0001>
module attributes {stable_mosaic.version = 11 : i64} {
  func.func @_copy_kernel(%arg0: i32, %arg1: i32, %arg2: memref<48x512xf32, #tpu.memory_space<vmem>>, %arg3: memref<48x512xf32, #tpu.memory_space<vmem>>) attributes {dimension_semantics = [#tpu.dimension_semantics<parallel>, #tpu.dimension_semantics<parallel>], iteration_bounds = array<i64: 2, 1>, scalar_prefetch = 0 : i64, scratch_operands = 0 : i64, tpu.core_type = #tpu.core_type<tc>, window_params = [{transform_indices = @transform_0, window_bounds = array<i64: 48, 512>}, {transform_indices = @transform_1, window_bounds = array<i64: 48, 512>}]} {
    %c0 = arith.constant 0 : index
    %c0_0 = arith.constant 0 : index
    %0 = vector.load %arg2[%c0, %c0_0] : memref<48x512xf32, #tpu.memory_space<vmem>>, vector<48x512xf32>
    %c0_1 = arith.constant 0 : index
    %c0_2 = arith.constant 0 : index
    %1 = vector.load %arg3[%c0_1, %c0_2] : memref<48x512xf32, #tpu.memory_space<vmem>>, vector<48x512xf32>
    tpu.vector_store %arg3[%c0_1, %c0_2], %0 {strides = array<i32>} : memref<48x512xf32, #tpu.memory_space<vmem>>, vector<48x512xf32>,
    return
  }
  func.func @transform_0(%arg0: i32, %arg1: i32) -> (i32, i32) {
    %c0_i32 = arith.constant 0 : i32
    return %arg0, %arg1 : i32, i32
  }
  func.func @transform_1(%arg0: i32, %arg1: i32) -> (i32, i32) {
    %c0_i32 = arith.constant 0 : i32
    return %arg0, %arg1 : i32, i32
  }
}

</mosaic_0001>

<bundles_post_ra>
// kernel: tpu_custom_call.1
= control target key start
LH: loop header
LB: loop body
LE: loop exit
PB: predicated region body
PF: predicated region fallthrough
CT: control target
= control target key end

     0   :  { %6 = vsyncpa [#allocation3], 0  ;;  %s712_s0 = inlined_call_operand.hbm [shape: f32[96,640], index: 0, kind: input, shape index: {}]   ;;  %s713_s1 = inlined_call_operand.hbm [shape: f32[96,512], index: 1, kind: output, shape index: {}]  }
   0x1   :  { %8 = vsyncpa [#allocation3 + $0x1], 0 }
   0x2   :  { %9 = vsyncpa [#allocation4], 0 }
   0x3   :  { %11 = vsyncpa [#allocation4 + $0x1], 0  ;;  %s539_s6 = smov 0   ;;  %s541_s7 = smov 0  }
   0x4   :  { %s543_s8 = smov 0   ;;  %s545_s9 = smov 0  }
   0x5   :  { %s547_s10 = smov 0   ;;  %s549_s11 = smov 0  }
   0x6 LB: > { %s326_s12 = sadd.s32 4294967295, %s522_s11   ;;  %s327_s13 = sadd.s32 4294967294, %s522_s11   ;;  %s522_s11 = sphi %s549_s11, %s17_s11   ;;  %s518_s10 = sphi %s547_s10, %s722_s10   ;;  %s514_s9 = sphi %s545_s9, %s721_s9   ;;  %s510_s8 = sphi %s543_s8, %s720_s8   ;;  %s506_s7 = sphi %s541_s7, %s719_s7   ;;  %s502_s6 = sphi %s539_s6, %s718_s6  }
   0x7   : > { %s29_s14 = sadd.s32 1, %s518_s10  ;;  %s38_s15 = sadd.s32 1, %s510_s8 }
   0x8   : > { %p31_p0 = scmp.ge.s32.totalorder %s29_s14, 2  ;;  %p45_p1 = scmp.ne.s32.totalorder %s510_s8, %s506_s7 }
   0x9   : > { %p46_p2 = scmp.eq.s32.totalorder %s522_s11, 0  ;;  %p51_p3 = scmp.ne.s32.totalorder %s506_s7, %s502_s6 }
   0xa   : > { %s724_s14 = smov (%p31_p0, %s29_s14), 0  ;;  %p52_p5 = scmp.eq.s32.totalorder %s326_s12, 0 }
   0xb   : > { %p580_p4 = por %p46_p2, %p45_p1  ;;  %s33_s17 = ssub.s32 %s518_s10, %s724_s14 }
   0xc   : > { %p77_p6 = scmp.eq.s32.totalorder %s326_s12, 1  ;;  %p36_p7 = scmp.eq.s32.totalorder %s33_s17, 0 }
   0xd   : > { %p586_p8 = por %p52_p5, %p51_p3  ;;  %p83_p10 = scmp.eq.s32.totalorder %s327_s13, 1 }
   0xe   : > { %p590_p9 = por %p77_p6, %p45_p1  ;;  %p329_p12 = scmp.ge.s32.totalorder %s522_s11, 2 }
   0xf   : > { %s595_s20 = scalar_select %p36_p7, %s510_s8, %s38_s15  }
  0x10   : > { %p597_p11 = por %p83_p10, %p51_p3  ;;  %p354_p13 = scmp.lt.s32.totalorder %s522_s11, 2 }
  0x11   : > { %s103_s22 = sand.u32 1, %s510_s8   ;;  %s355_s24 = smul.u32 240, %s518_s10 }
  0x12   : > { %s339_s23 = smul.u32 192, %s103_s22  ;;  %p347_p0 = pnand %p354_p13, %p580_p4 }
  0x13   : > { %s121_s29 = scalar_lea.hbm %s712_s0, %s355_s24  ;;  %p331_p1 = scmp.ge.s32.totalorder %s522_s11, 1 }
  0x14   : > { %s107_s25 = scalar_lea.vmem [#allocation2], %s339_s23  ;;  %s124_s30 = sshll.u32 %s121_s29, 4  ;;  %s125_s30 = int_to_ptr.hbm [resolvable:$true] %s124_s30 }
  0x15   : > { %s126_s26 = sshll.u32 %s107_s25, 4  ;;  %s104_s2 = scalar_lea.sflag [#allocation3], %s103_s22  ;;  %s127_s26 = int_to_ptr.vmem [resolvable:$true] %s126_s26 }
  0x16   : > { %s524_s3 = smov 640   ;;  %s525_s4 = smov 512  }
  0x17   : > { %s526_s5 = smov 32   ;;  %p134_p2 = scmp.lt.s32.totalorder %s522_s11, 3 }
  0x18   : > { %349 = dma.hbm_to_vmem [thread:$0]  (!%p347_p0), %s125_s30, 3072, %s127_s26, %s104_s2, %s524_s3, %s525_s4, %s526_s5  }
  0x19   : > { %p135_p3 = pnand %p331_p1, %p134_p2 }
  0x1a   : > { %s613_s12 = sand.u32 (!%p135_p3), 1, %s506_s7  }
  0x1b   : > { %138 = sbr.rel (%p135_p3) target bundleno = 61 (0x3d), region = 24  ;;  %s141_s15 = scalar_lea.sflag (!%p135_p3), [#allocation3], %s613_s12 }
  0x1c   : > { %s341_s13 = smul.u32 (!%p135_p3), 192, %s613_s12 }
  0x1e   : > { %s617_s16 = scalar_lea.vmem (!%p135_p3), [#allocation2], %s341_s13 }
  0x20   : > { %493 = dma.done.wait (%p586_p8), %s141_s15, 3072  }
  0x21   : > { %495 = vsyncadd (%p586_p8), %s141_s15, 4294964224  ;;  %v172_v0 = vld [vmem:[%s617_s16] sm:$0xff]  ;;  %v173_v1 = vld [vmem:[%s617_s16 + $0x8] sm:$0xff]  ;;  %s626_s17 = scalar_lea.vmem [#allocation5], %s341_s13  ;;  %s338_s18 = smul.u32 192, %s514_s9 }
  0x22   : > { %v174_v2 = vld [vmem:[%s617_s16 + $0x10] sm:$0xff]  ;;  %196 = vst [vmem:[%s626_s17] sm:$0xff] %v172_v0  ;;  %v175_v3 = vld [vmem:[%s617_s16 + $0x18] sm:$0xff]  ;;  %v176_v4 = vld [vmem:[%s617_s16 + $0x20] sm:$0xff]  ;;  %s236_s9 = sshll.u32 %s626_s17, 4  ;;  %s221_s26 = scalar_lea.sflag [#allocation4], %s613_s12  ;;  %s237_s9 = int_to_ptr.vmem [resolvable:$true] %s236_s9 }
  0x23   : > { %197 = vst [vmem:[%s626_s17 + $0x8] sm:$0xff] %v173_v1  ;;  %v177_v5 = vld [vmem:[%s617_s16 + $0x28] sm:$0xff]  ;;  %v178_v6 = vld [vmem:[%s617_s16 + $0x30] sm:$0xff]  ;;  %v179_v7 = vld [vmem:[%s617_s16 + $0x38] sm:$0xff]  ;;  %s235_s24 = scalar_lea.hbm %s713_s1, %s338_s18  ;;  %s460_s2 = scalar_lea.hbm %s713_s1, 384 }
  0x24   : > { %198 = vst [vmem:[%s626_s17 + $0x10] sm:$0xff] %v174_v2  ;;  %v180_v8 = vld [vmem:[%s617_s16 + $0x40] sm:$0xff]  ;;  %v181_v9 = vld [vmem:[%s617_s16 + $0x48] sm:$0xff]  ;;  %v182_v10 = vld [vmem:[%s617_s16 + $0x50] sm:$0xff]  ;;  %s238_s25 = sshll.u32 %s235_s24, 4  ;;  %s239_s25 = int_to_ptr.hbm [resolvable:$true] %s238_s25 }
  0x25   : > { %199 = vst [vmem:[%s626_s17 + $0x18] sm:$0xff] %v175_v3  ;;  %v183_v11 = vld [vmem:[%s617_s16 + $0x58] sm:$0xff]  ;;  %v184_v12 = vld [vmem:[%s617_s16 + $0x60] sm:$0xff]  ;;  %v185_v13 = vld [vmem:[%s617_s16 + $0x68] sm:$0xff]  ;;  %s454_s27 = sshra.s32 %s239_s25, 4  ;;  %s455_s27 = int_to_ptr.hbm [resolvable:$true] %s454_s27 }
  0x26   : > { %200 = vst [vmem:[%s626_s17 + $0x20] sm:$0xff] %v176_v4  ;;  %v186_v14 = vld [vmem:[%s617_s16 + $0x70] sm:$0xff]  ;;  %v187_v15 = vld [vmem:[%s617_s16 + $0x78] sm:$0xff]  ;;  %v188_v16 = vld [vmem:[%s617_s16 + $0x80] sm:$0xff]  ;;  %s456_s28 = scalar_lea.hbm %s455_s27, 192  ;;  %p461_p7 = scmp.lt.s32.totalorder %s455_s27, %s713_s1 }
  0x27   : > { %201 = vst [vmem:[%s626_s17 + $0x28] sm:$0xff] %v177_v5  ;;  %v189_v17 = vld [vmem:[%s617_s16 + $0x88] sm:$0xff]  ;;  %v190_v18 = vld [vmem:[%s617_s16 + $0x90] sm:$0xff]  ;;  %v191_v19 = vld [vmem:[%s617_s16 + $0x98] sm:$0xff]  ;;  %p457_p4 = scmp.ne.s32.totalorder %s455_s27, %s456_s28  ;;  %p462_p8 = scmp.lt.s32.totalorder %s460_s2, %s456_s28 }
  0x28   : > { %202 = vst [vmem:[%s626_s17 + $0x30] sm:$0xff] %v178_v6  ;;  %v192_v20 = vld [vmem:[%s617_s16 + $0xa0] sm:$0xff]  ;;  %v193_v21 = vld [vmem:[%s617_s16 + $0xa8] sm:$0xff]  ;;  %v194_v22 = vld [vmem:[%s617_s16 + $0xb0] sm:$0xff] }
  0x29   : > { %203 = vst [vmem:[%s626_s17 + $0x38] sm:$0xff] %v179_v7  ;;  %v195_v23 = vld [vmem:[%s617_s16 + $0xb8] sm:$0xff]  ;;  %p458_p5 = pnand %p457_p4, %p590_p9  ;;  %p463_p10 = por %p462_p8, %p461_p7 }
  0x2a   : > { %204 = vst [vmem:[%s626_s17 + $0x40] sm:$0xff] %v180_v8 }
  0x2b   : > { %205 = vst [vmem:[%s626_s17 + $0x48] sm:$0xff] %v181_v9  ;;  %p459_p6 = pneg %p458_p5 }
  0x2c   : > { %206 = vst [vmem:[%s626_s17 + $0x50] sm:$0xff] %v182_v10 }
  0x2d   : > { %207 = vst [vmem:[%s626_s17 + $0x58] sm:$0xff] %v183_v11  ;;  %p464_p13 = pnand %p463_p10, %p459_p6 }
  0x2e   : > { %208 = vst [vmem:[%s626_s17 + $0x60] sm:$0xff] %v184_v12 }
  0x2f   : > { %209 = vst [vmem:[%s626_s17 + $0x68] sm:$0xff] %v185_v13 }
  0x30   : > { %210 = vst [vmem:[%s626_s17 + $0x70] sm:$0xff] %v186_v14 }
  0x31   : > { %211 = vst [vmem:[%s626_s17 + $0x78] sm:$0xff] %v187_v15 }
  0x32   : > { %212 = vst [vmem:[%s626_s17 + $0x80] sm:$0xff] %v188_v16 }
  0x33   : > { %213 = vst [vmem:[%s626_s17 + $0x88] sm:$0xff] %v189_v17 }
  0x34   : > { %214 = vst [vmem:[%s626_s17 + $0x90] sm:$0xff] %v190_v18 }
  0x35   : > { %215 = vst [vmem:[%s626_s17 + $0x98] sm:$0xff] %v191_v19 }
  0x36   : > { %216 = vst [vmem:[%s626_s17 + $0xa0] sm:$0xff] %v192_v20 }
  0x37   : > { %217 = vst [vmem:[%s626_s17 + $0xa8] sm:$0xff] %v193_v21 }
  0x38   : > { %218 = vst [vmem:[%s626_s17 + $0xb0] sm:$0xff] %v194_v22 }
  0x39   : > { %219 = vst [vmem:[%s626_s17 + $0xb8] sm:$0xff] %v195_v23 }
  0x3a   : > { %467 = shalt.err (!%p464_p13)
}
  0x3b   : > { %s527_s5 = smov 512   ;;  %s528_s12 = smov 32  }
  0x3c   : > { %344 = dma.vmem_to_hbm [thread:$0]  (%p590_p9), %s237_s9, 3072, %s239_s25, %s221_s26, %s527_s5, %s527_s5, %s528_s12  }
  0x3d PF: > { %s253_s13 = sand.u32 1, %s502_s6   ;;  %p351_p0 = pnand %p329_p12, %p597_p11 }
  0x3e   : > { %s254_s15 = scalar_lea.sflag [#allocation4], %s253_s13 }
  0x3f   : > { %p352_p1 = pneg %p351_p0 }
  0x41   : > { %497 = dma.done.wait (%p352_p1), %s254_s15, 3072  }
  0x42   : > { %499 = vsyncadd (%p352_p1), %s254_s15, 4294964224  ;;  %s17_s11 = sadd.s32 1, %s522_s11   ;;  %s718_s6 = smov %s506_s7 }
  0x43   : > { %p14_p2 = scmp.ge.s32.totalorder %s17_s11, 4   ;;  %s719_s7 = smov %s510_s8 }
  0x44   : > { %s720_s8 = smov %s595_s20  ;;  %s721_s9 = smov %s518_s10 }
  0x45   : > { %s722_s10 = smov %s724_s14  ;;  %16 = sbr.rel (!%p14_p2) target bundleno = 6 (0x6), region = 69 }
  0x4a   :  { %260 = vsyncpa [#allocation3], 1 }
  0x4b   :  { %262 = vsyncpa [#allocation3 + $0x1], 1 }
  0x4c   :  { %263 = vsyncpa [#allocation4], 1 }
  0x4d   :  { %265 = vsyncpa [#allocation4 + $0x1], 1 }

</bundles_post_ra>
